<compile_context>
chip_gen: v6e
topology: v6e:2x2x1
jax: 0.10.0
libtpu: 0.0.40
codegen_flags: <defaults>
</compile_context>

<pallas_src>
import functools

import jax
import jax.numpy as jnp
from jax.experimental import pallas as pl
from jax.experimental.pallas import tpu as pltpu


def _round_up(x, m):
    return (x + m - 1) // m * m


def _bf16_elementwise_ok():
    """True on TPU generations with a native bf16 VPU/EUP (v6e and later)."""
    try:
        kind = jax.devices()[0].device_kind.lower()
    except Exception:
        return False
    return any(tag in kind for tag in ("v6", "v7", "7x", "v8"))


def _ffn_kernel(x_ref, w1_ref, b1_ref, w2_ref, b2_ref, o_ref, *, elem_dtype):
    # x_ref: (tm, dim), w1_ref: (dim, hidden), b1_ref: (1, hidden) f32,
    # w2_ref: (hidden, dim), b2_ref: (1, dim) f32, o_ref: (tm, dim).
    # Cast the activation tile to the MXU operand dtype *inside* the kernel (VPU op on a
    # VMEM-resident tile) instead of an extra HBM cast pass in the wrapper.
    x = x_ref[...].astype(w1_ref.dtype)

    # Linear(dim -> hidden): MXU with f32 accumulation, bias add in f32.
    h = jnp.dot(x, w1_ref[...], preferred_element_type=jnp.float32) + b1_ref[...]

    # SiLU(h) = h * sigmoid(h) = h * (0.5 * tanh(0.5 * h) + 0.5): one EUP op per element
    # (instead of exp + divide). elem_dtype is bf16 on v6e/v7x, f32 on v5e.
    h = h.astype(elem_dtype)
    h = h * (jnp.tanh(h * 0.5) * 0.5 + 0.5)

    # Dropout(p=0.0) is identity (eval mode); a real dropout would use pltpu.prng_random_bits.

    # Linear(hidden -> dim): MXU with f32 accumulation, bias add in f32.
    y = jnp.dot(h.astype(w2_ref.dtype), w2_ref[...], preferred_element_type=jnp.float32)
    o_ref[...] = (y + b2_ref[...]).astype(o_ref.dtype)


def prepare_params(w1_t, b1, w2_t, b2, compute_dtype=jnp.bfloat16):
    """One-time parameter preparation (call once, outside the per-step forward).

    Casts the (in, out)-layout weights to the MXU operand dtype (bf16 by default) and keeps
    the biases as (1, H)/(1, D) float32 rows so the bias add stays on the f32 accumulator.
    """
    cdt = jnp.dtype(compute_dtype)
    return (
        jnp.asarray(w1_t, dtype=cdt),
        jnp.asarray(b1, dtype=jnp.float32).reshape(1, -1),
        jnp.asarray(w2_t, dtype=cdt),
        jnp.asarray(b2, dtype=jnp.float32).reshape(1, -1),
    )


@functools.partial(jax.jit, static_argnames=("tm", "compute_dtype", "out_dtype"))
def feed_forward(x, w1_t, b1, w2_t, b2, *, tm=512, compute_dtype=None, out_dtype=None):
    """MobileViT FeedForward.

    x: (B, N, dim). w1_t: (dim, hidden), b1: (hidden,) or (1, hidden),
    w2_t: (hidden, dim), b2: (dim,) or (1, dim). Weights are stored pre-transposed
    (in, out) so the kernel computes x @ W + b, matching PyTorch's x @ W.T + b.

    compute_dtype: MXU operand dtype; defaults to the weights' dtype (use prepare_params to
    get bf16 operands). Accumulation is always f32. out_dtype defaults to x.dtype.
    """
    B, N, dim = x.shape
    hidden = w1_t.shape[-1]
    M = B * N

    cdt = jnp.dtype(compute_dtype) if compute_dtype is not None else jnp.dtype(w1_t.dtype)
    odt = jnp.dtype(out_dtype) if out_dtype is not None else jnp.dtype(x.dtype)

    # SiLU/elementwise dtype: bf16 on chips with a bf16 VPU/EUP (v6e/v7x) when the matmul
    # operands are bf16; f32 otherwise (v5e has no bf16 VPU/EUP).
    if cdt == jnp.dtype(jnp.bfloat16) and _bf16_elementwise_ok():
        elem_dtype = jnp.dtype(jnp.bfloat16)
    else:
        elem_dtype = jnp.dtype(jnp.float32)

    # No-op for prepared params; cheap one-off cast/reshape for raw params (weights are tiny).
    w1p = w1_t.astype(cdt)
    w2p = w2_t.astype(cdt)
    b1p = b1.reshape(1, hidden).astype(jnp.float32)
    b2p = b2.reshape(1, dim).astype(jnp.float32)

    # Row-tile sizing. Big tiles amortize the ~0.35us per-grid-step overhead; only the row
    # (sublane) axis of the x/out blocks is constrained since feature axes use full extents.
    xsz = jnp.dtype(x.dtype).itemsize
    osz = odt.itemsize
    row_align = 16 if min(xsz, osz) == 2 else 8
    tm_eff = max(row_align, _round_up(min(int(tm), M), row_align))
    # Keep >= 2 grid steps when M allows it so the "parallel" axis can be sharded across
    # both TensorCores on v7x (v5e/v6e have a single TC; this is harmless there).
    if pl.cdiv(M, tm_eff) < 2 and M > row_align:
        tm_eff = _round_up(pl.cdiv(M, 2), row_align)
    grid = (pl.cdiv(M, tm_eff),)

    # VMEM budget from the actual footprint (feature axes rounded to lane tiles, weights and
    # x/out tiles double-buffered by the pipeline), capped at 3/4 of physical VMEM.
    csz = cdt.itemsize
    dim_r = _round_up(dim, 128)
    hid_r = _round_up(hidden, 128)
    tm_r = _round_up(tm_eff, 16)
    vmem_bytes = (
        2 * (dim_r * hid_r + hid_r * dim_r) * csz   # W1, W2 (x2 pipeline buffers)
        + 2 * 8 * (hid_r + dim_r) * 4               # biases (f32, sublane-padded, x2 buffers)
        + 2 * tm_r * dim_r * (xsz + osz)            # x tile in + out tile (x2 buffers)
        + tm_r * hid_r * (4 + csz)                  # f32 hidden accumulator + compute copy
        + tm_r * dim_r * 4                          # f32 output accumulator
    )
    vmem_cap = 128 << 20
    try:
        vmem_cap = int(pltpu.get_tpu_info().vmem_capacity_bytes)
    except Exception:
        pass
    vmem_limit = int(min(max(vmem_bytes + (2 << 20), 16 << 20), (vmem_cap * 3) // 4))

    kernel = functools.partial(_ffn_kernel, elem_dtype=elem_dtype)

    out2d = pl.pallas_call(
        kernel,
        out_shape=jax.ShapeDtypeStruct((M, dim), odt),
        grid_spec=pltpu.PrefetchScalarGridSpec(
            num_scalar_prefetch=0,
            grid=grid,
            in_specs=[
                pl.BlockSpec((tm_eff, dim), lambda i: (i, 0)),      # x row tile
                pl.BlockSpec((dim, hidden), lambda i: (0, 0)),      # W1^T (resident, full extent)
                pl.BlockSpec((1, hidden), lambda i: (0, 0)),        # b1 (f32)
                pl.BlockSpec((hidden, dim), lambda i: (0, 0)),      # W2^T (resident, full extent)
                pl.BlockSpec((1, dim), lambda i: (0, 0)),           # b2 (f32)
            ],
            out_specs=pl.BlockSpec((tm_eff, dim), lambda i: (i, 0)),
        ),
        compiler_params=pltpu.CompilerParams(
            dimension_semantics=("parallel",),   # row tiles independent -> megacore shardable
            vmem_limit_bytes=vmem_limit,
        ),
    )(x.reshape(M, dim), w1p, b1p, w2p, b2p)

    return out2d.reshape(B, N, dim)


def init_params(key, dim, hidden_dim, dtype=jnp.float32):
    """Deterministic synthetic parameters mirroring nn.Linear shapes (stored pre-transposed)."""
    k1, k2, k3, k4 = jax.random.split(key, 4)
    bound1 = 1.0 / jnp.sqrt(dim)
    bound2 = 1.0 / jnp.sqrt(hidden_dim)
    w1_t = jax.random.uniform(k1, (dim, hidden_dim), dtype, -bound1, bound1)
    b1 = jax.random.uniform(k2, (hidden_dim,), dtype, -bound1, bound1)
    w2_t = jax.random.uniform(k3, (hidden_dim, dim), dtype, -bound2, bound2)
    b2 = jax.random.uniform(k4, (dim,), dtype, -bound2, bound2)
    return w1_t, b1, w2_t, b2


def _reference(x, w1_t, b1, w2_t, b2):
    h = x @ w1_t + b1
    h = h * jax.nn.sigmoid(h)
    return h @ w2_t + b2


if __name__ == "__main__":
    B, N, dim, hidden_dim = 2, 8, 32, 64  # small transformer-token shapes

    key = jax.random.PRNGKey(0)
    kx, kp = jax.random.split(key)
    x = jax.random.normal(kx, (B, N, dim), jnp.float32)
    w1_t, b1, w2_t, b2 = init_params(kp, dim, hidden_dim)

    ref = _reference(x, w1_t, b1, w2_t, b2)

    # Throughput configuration (default): bf16 MXU operands prepared once, f32 accumulation.
    params_bf16 = prepare_params(w1_t, b1, w2_t, b2)  # defaults to bf16
    out = feed_forward(x, *params_bf16)
    out = jax.block_until_ready(out)
    assert out.shape == (B, N, dim)
    assert out.dtype == x.dtype
    assert jnp.allclose(out, ref, atol=1e-1, rtol=1e-1), "bf16 mismatch vs reference"

    # Exactness check: f32 operands end-to-end.
    out_f32 = feed_forward(x, w1_t, b1, w2_t, b2, compute_dtype=jnp.float32)
    out_f32 = jax.block_until_ready(out_f32)
    assert out_f32.shape == (B, N, dim)
    assert jnp.allclose(out_f32, ref, atol=1e-5, rtol=1e-5), "f32 mismatch vs reference"

    print("KERNEL_OK")
</pallas_src>

<mosaic_0001>
module attributes {stable_mosaic.version = 11 : i64} {
  func.func @_ffn_kernel(%arg0: i32, %arg1: memref<8x32xf32, #tpu.memory_space<vmem>>, %arg2: memref<32x64xbf16, #tpu.memory_space<vmem>>, %arg3: memref<1x64xf32, #tpu.memory_space<vmem>>, %arg4: memref<64x32xbf16, #tpu.memory_space<vmem>>, %arg5: memref<1x32xf32, #tpu.memory_space<vmem>>, %arg6: memref<8x32xf32, #tpu.memory_space<vmem>>) attributes {dimension_semantics = [#tpu.dimension_semantics<parallel>], iteration_bounds = array<i64: 2>, scalar_prefetch = 0 : i64, scratch_operands = 0 : i64, tpu.core_type = #tpu.core_type<tc>, window_params = [{transform_indices = @transform_0, window_bounds = array<i64: 8, 32>}, {pipeline_mode = #tpu.pipeline_mode<synchronous>, transform_indices = @transform_1, window_bounds = array<i64: 32, 64>}, {pipeline_mode = #tpu.pipeline_mode<synchronous>, transform_indices = @transform_2, window_bounds = array<i64: 1, 64>}, {pipeline_mode = #tpu.pipeline_mode<synchronous>, transform_indices = @transform_3, window_bounds = array<i64: 64, 32>}, {pipeline_mode = #tpu.pipeline_mode<synchronous>, transform_indices = @transform_4, window_bounds = array<i64: 1, 32>}, {transform_indices = @transform_5, window_bounds = array<i64: 8, 32>}]} {
    %c0 = arith.constant 0 : index
    %c0_0 = arith.constant 0 : index
    %0 = vector.load %arg1[%c0, %c0_0] : memref<8x32xf32, #tpu.memory_space<vmem>>, vector<8x32xf32>
    %1 = arith.truncf %0 : vector<8x32xf32> to vector<8x32xbf16>
    %c0_1 = arith.constant 0 : index
    %c0_2 = arith.constant 0 : index
    %2 = vector.load %arg2[%c0_1, %c0_2] : memref<32x64xbf16, #tpu.memory_space<vmem>>, vector<32x64xbf16>
    %cst = arith.constant dense<0.000000e+00> : vector<8x64xf32>
    %3 = tpu.matmul %1, %2, %cst {dimension_numbers = #tpu.dot_dimension_numbers<[1], [0], [0], [1], [0, 0, 1, 1], [], []>} : vector<8x32xbf16>, vector<32x64xbf16>, vector<8x64xf32> -> vector<8x64xf32>
    %c0_3 = arith.constant 0 : index
    %c0_4 = arith.constant 0 : index
    %4 = vector.load %arg3[%c0_3, %c0_4] : memref<1x64xf32, #tpu.memory_space<vmem>>, vector<1x64xf32>
    %5 = vector.broadcast %4 : vector<1x64xf32> to vector<8x64xf32>
    %6 = arith.addf %3, %5 : vector<8x64xf32>
    %cst_5 = arith.constant 5.000000e-01 : f32
    %7 = vector.broadcast %cst_5 : f32 to vector<8x64xf32>
    %8 = arith.mulf %6, %7 : vector<8x64xf32>
    %9 = math.tanh %8 : vector<8x64xf32>
    %cst_6 = arith.constant 5.000000e-01 : f32
    %10 = vector.broadcast %cst_6 : f32 to vector<8x64xf32>
    %11 = arith.mulf %9, %10 : vector<8x64xf32>
    %cst_7 = arith.constant 5.000000e-01 : f32
    %12 = vector.broadcast %cst_7 : f32 to vector<8x64xf32>
    %13 = arith.addf %11, %12 : vector<8x64xf32>
    %14 = arith.mulf %6, %13 : vector<8x64xf32>
    %15 = arith.truncf %14 : vector<8x64xf32> to vector<8x64xbf16>
    %c0_8 = arith.constant 0 : index
    %c0_9 = arith.constant 0 : index
    %16 = vector.load %arg4[%c0_8, %c0_9] : memref<64x32xbf16, #tpu.memory_space<vmem>>, vector<64x32xbf16>
    %cst_10 = arith.constant dense<0.000000e+00> : vector<8x32xf32>
    %17 = tpu.matmul %15, %16, %cst_10 {dimension_numbers = #tpu.dot_dimension_numbers<[1], [0], [0], [1], [0, 0, 1, 1], [], []>} : vector<8x64xbf16>, vector<64x32xbf16>, vector<8x32xf32> -> vector<8x32xf32>
    %c0_11 = arith.constant 0 : index
    %c0_12 = arith.constant 0 : index
    %18 = vector.load %arg5[%c0_11, %c0_12] : memref<1x32xf32, #tpu.memory_space<vmem>>, vector<1x32xf32>
    %19 = vector.broadcast %18 : vector<1x32xf32> to vector<8x32xf32>
    %20 = arith.addf %17, %19 : vector<8x32xf32>
    %c0_13 = arith.constant 0 : index
    %c0_14 = arith.constant 0 : index
    %21 = vector.load %arg6[%c0_13, %c0_14] : memref<8x32xf32, #tpu.memory_space<vmem>>, vector<8x32xf32>
    tpu.vector_store %arg6[%c0_13, %c0_14], %20 {strides = array<i32>} : memref<8x32xf32, #tpu.memory_space<vmem>>, vector<8x32xf32>,
    return
  }
  func.func @transform_0(%arg0: i32) -> (i32, i32) {
    %c0_i32 = arith.constant 0 : i32
    %c0_i32_0 = arith.constant 0 : i32
    return %arg0, %c0_i32 : i32, i32
  }
  func.func @transform_1(%arg0: i32) -> (i32, i32) {
    %c0_i32 = arith.constant 0 : i32
    %c0_i32_0 = arith.constant 0 : i32
    %c0_i32_1 = arith.constant 0 : i32
    return %c0_i32, %c0_i32_0 : i32, i32
  }
  func.func @transform_2(%arg0: i32) -> (i32, i32) {
    %c0_i32 = arith.constant 0 : i32
    %c0_i32_0 = arith.constant 0 : i32
    %c0_i32_1 = arith.constant 0 : i32
    return %c0_i32, %c0_i32_0 : i32, i32
  }
  func.func @transform_3(%arg0: i32) -> (i32, i32) {
    %c0_i32 = arith.constant 0 : i32
    %c0_i32_0 = arith.constant 0 : i32
    %c0_i32_1 = arith.constant 0 : i32
    return %c0_i32, %c0_i32_0 : i32, i32
  }
  func.func @transform_4(%arg0: i32) -> (i32, i32) {
    %c0_i32 = arith.constant 0 : i32
    %c0_i32_0 = arith.constant 0 : i32
    %c0_i32_1 = arith.constant 0 : i32
    return %c0_i32, %c0_i32_0 : i32, i32
  }
  func.func @transform_5(%arg0: i32) -> (i32, i32) {
    %c0_i32 = arith.constant 0 : i32
    %c0_i32_0 = arith.constant 0 : i32
    return %arg0, %c0_i32 : i32, i32
  }
}

</mosaic_0001>

<bundles_post_ra>
// kernel: feed_forward.1
= control target key start
LH: loop header
LB: loop body
LE: loop exit
PB: predicated region body
PF: predicated region fallthrough
CT: control target
= control target key end

     0   :  { %10 = vsyncpa [#allocation3], 0  ;;  %s770_s0 = inlined_call_operand.vmem [shape: f32[16,32], index: 0, kind: input, shape index: {}]   ;;  %s771_s1 = inlined_call_operand.vmem [shape: bf16[32,64], index: 1, kind: input, shape index: {}]   ;;  %s772_s2 = inlined_call_operand.vmem [shape: f32[1,64], index: 2, kind: input, shape index: {}]   ;;  %s773_s3 = inlined_call_operand.vmem [shape: bf16[64,32], index: 3, kind: input, shape index: {}]   ;;  %s774_s4 = inlined_call_operand.vmem [shape: f32[1,32], index: 4, kind: input, shape index: {}]   ;;  %s775_s5 = inlined_call_operand.hbm [shape: f32[16,32], index: 5, kind: output, shape index: {}]  }
   0x1   :  { %12 = vsyncpa [#allocation3 + $0x1], 0  ;;  %s645_s18 = smov 0   ;;  %s647_s19 = smov 0  }
   0x2   :  { %s649_s20 = smov 0   ;;  %s651_s21 = smov 0  }
   0x3 LB: > { %s666_s22 = sadd.s32 4294967295, %s610_s21   ;;  %s453_s23 = sadd.s32 4294967294, %s610_s21   ;;  %s610_s21 = sphi %s651_s21, %s781_s21   ;;  %s606_s20 = sphi %s649_s20, %s780_s20   ;;  %s602_s19 = sphi %s647_s19, %s779_s19   ;;  %s598_s18 = sphi %s645_s18, %s778_s18  }
   0x4   : > { %s670_s24 = sadd.s32 1, %s610_s21   ;;  %s135_s25 = sadd.s32 1, %s606_s20 }
   0x5   : > { %s132_s26 = ssub.s32 %s610_s21, %s670_s24  ;;  %p145_p0 = scmp.ne.s32.totalorder %s606_s20, %s602_s19 }
   0x6   : > { %p133_p1 = scmp.eq.s32.totalorder %s132_s26, 0  ;;  %p146_p2 = scmp.eq.s32.totalorder %s666_s22, 1 }
   0x7   : > { %p151_p3 = scmp.ne.s32.totalorder %s602_s19, %s598_s18  ;;  %p152_p4 = scmp.eq.s32.totalorder %s453_s23, 1 }
   0x8   : > { %s681_s27 = scalar_select %p133_p1, %s606_s20, %s135_s25  }
   0x9   : > { %p683_p5 = por %p146_p2, %p145_p0  ;;  %p687_p6 = por %p152_p4, %p151_p3 }
   0xa   : > { %p456_p7 = scmp.ge.s32.totalorder %s610_s21, 1  ;;  %p189_p8 = scmp.lt.s32.totalorder %s610_s21, 3 }
   0xc   : > { %p190_p9 = pnand %p456_p7, %p189_p8 }
   0xd   : > { %p216_p10 = scmp.lt.s32.totalorder (!%p190_p9), %s666_s22, 1  ;;  %s213_s8 = sand.u32 (!%p190_p9), 1, %s602_s19  }
   0xe   : > { %193 = sbr.rel (%p190_p9) target bundleno = 456 (0x1c8), region = 40  ;;  %s470_s12 = sshll.u32 (!%p190_p9), %s666_s22, 7 }
   0xf   : > { %s728_s17 = scalar_lea.hbm (!%p190_p9), %s775_s5, %s470_s12  ;;  %s381_s23 = scalar_lea.sflag (!%p190_p9), [#allocation3], %s213_s8 }
  0x10   : > { %s614_s25 = smov (!%p190_p9), [#allocation2]  }
  0x11   : > { %s554_s26 = sshll.u32 (!%p190_p9), %s614_s25, 4  ;;  %s555_s26 = int_to_ptr.vmem [resolvable:$false] %s554_s26 }
  0x12   : > { %s556_s30 = scalar_lea.vmem (!%p190_p9), %s555_s26, 256 }
  0x13   : > { %v542_v0 = vld [vmem:[%s771_s1 + $0x8] sm:$0xff]   ;;  %v612_v1 = vmov 0.0   ;;  %v543_v2 = vld [vmem:[%s771_s1] sm:$0xff]   ;;  %vm613_vm0 = vmmov 0   ;;  %s217_s9 = scalar_select %p216_p10, %s666_s22, 1  ;;  %vm246_vm1 = vcmask 261120  }
  0x14   : > { %481 = vmatprep.subr.bf16.mxu0 %v612_v1  ;;  %489 = vmatprep.subr.bf16.mxu1 %v612_v1  ;;  %v544_v5 = vld [vmem:[%s773_s3 + $0x18] sm:$0xff]   ;;  %v545_v6 = vld [vmem:[%s773_s3 + $0x10] sm:$0xff]   ;;  %v546_v7 = vld [vmem:[%s773_s3 + $0x8] sm:$0xff]   ;;  %vm335_vm2 = vcmask 523264  }
  0x15   : > { %482 = vmatpush3.bf16.msra.mxu0 %v542_v0  ;;  %485 = vmatprep.mubr.msk.bf16.mxu0 %vm613_vm0, %v612_v1  ;;  %s458_s10 = sshll.u32 %s217_s9, 3  ;;  %v547_v8 = vld [vmem:[%s773_s3] sm:$0xff]   ;;  %s457_s9 = sshll.u32 %s213_s8, 3 }
  0x16   : > { %483 = vmatprep.subr.bf16.mxu0 %v612_v1  ;;  %497 = vmatprep.mubr.msk.bf16.mxu1 %vm613_vm0, %v612_v1  ;;  %s219_s13 = scalar_lea.vmem %s770_s0, %s458_s10  ;;  %v459_v9 = vld [vmem:[%s772_s2] ss:$0 sm:$0xff] }
  0x17   : > { %v221_v3 = vld [vmem:[%s219_s13] sm:$0xff]  ;;  %490 = vmatpush3.bf16.msra.mxu1 %v544_v5  ;;  %s215_s13 = scalar_lea.vmem [#allocation2], %s457_s9 }
  0x18   : > { %v222_v4 = vpack.c.bf16 %v221_v3, %v221_v3  ;;  %491 = vmatprep.subr.bf16.mxu1 %v612_v1  ;;  %v463_v21 = vld [vmem:[%s774_s4] ss:$0 sm:$0xff]  ;;  %s394_s14 = sshll.u32 %s215_s13, 4  ;;  %s730_s14 = int_to_ptr.vmem [resolvable:$true] %s394_s14 }
  0x19   : > { %484 = vmatpush3.bf16.msra.mxu0 %v543_v2  ;;  %s550_s22 = scalar_lea.vmem %s730_s14, 128  ;;  %p557_p0 = scmp.lt.s32.totalorder %s730_s14, %s555_s26 }
  0x1a   : > { %p551_p11 = scmp.ne.s32.totalorder %s730_s14, %s550_s22  ;;  %p558_p1 = scmp.lt.s32.totalorder %s556_s30, %s550_s22 }
  0x1b   : > { %492 = vmatpush3.bf16.msra.mxu1 %v545_v6 }
  0x1c   : > { %486 = vmatmul.mubr.msk.bf16.vlgmr.msra.gmra.mxu0 %vm246_vm1, %v222_v4  ;;  %493 = vmatprep.subr.bf16.mxu1 %v612_v1  ;;  %p552_p12 = pnand %p551_p11, %p683_p5  ;;  %p559_p2 = por %p558_p1, %p557_p0 }
  0x1e   : > { %p553_p13 = pneg %p552_p12 }
  0x1f   : > { %494 = vmatpush3.bf16.msra.mxu1 %v546_v7 }
  0x20   : > { %495 = vmatprep.subr.bf16.mxu1 %v612_v1  ;;  %p560_p3 = pnand %p559_p2, %p553_p13 }
  0x23   : > { %496 = vmatpush3.bf16.msra.mxu1 %v547_v8 }
  0xdc   : > { %v284_v10 = vpop.f32.mrf.mxu0 }
  0xdd   : > { %v285_v11 = vadd.f32 %v459_v9, %v284_v10 }
  0xde   : > { %v487_v12 = vpop.f32.mrf.mxu0 }
  0xdf   : > { %v290_v13 = vmul.f32 0.5, %v285_v11 }
  0xe0   : > { %v287_v14 = vpop.f32.mrf.mxu0 }
  0xe1   : > { %548 = vtanh.f32 %v290_v13 }
  0xe2   : > { %v488_v15 = vpop.f32.mrf.mxu0 }
  0xee   : > { %v549_v16 = vpop.eup %548 }
  0xef   : > { %v292_v17 = vmul.f32 0.5, %v549_v16 }
  0xf1   : > { %v293_v18 = vadd.f32 0.5, %v292_v17 }
  0xf3   : > { %v294_v19 = vmul.f32 %v293_v18, %v285_v11 }
  0xf5   : > { %v295_v20 = vpack.c.bf16 %v294_v19, %v294_v19 }
  0xf7   : > { %498 = vmatmul.mubr.msk.bf16.vlgmr.msra.gmra.mxu1 %vm335_vm2, %v295_v20 }
 0x1b7   : > { %v373_v22 = vpop.f32.mrf.mxu1 }
 0x1b8   : > { %v374_v23 = vadd.f32 %v463_v21, %v373_v22 }
 0x1b9   : > { %v499_v24 = vpop.f32.mrf.mxu1 }
 0x1ba   : > { %379 = vst.msk [vmem:[%s215_s13] sm:$0xff] %vm246_vm1, %v374_v23 }
 0x1bb   : > { %v376_v25 = vpop.f32.mrf.mxu1 }
 0x1bc   : > { %563 = shalt.err (!%p560_p3)
}
 0x1bd   : > { %s564_s6 = scalar_lea.hbm %s728_s17, 128  ;;  %s568_s9 = scalar_lea.hbm %s775_s5, 256 }
 0x1be   : > { %p565_p4 = scmp.ne.s32.totalorder %s728_s17, %s564_s6  ;;  %p569_p9 = scmp.lt.s32.totalorder %s728_s17, %s775_s5 }
 0x1bf   : > { %p570_p10 = scmp.lt.s32.totalorder %s568_s9, %s564_s6 }
 0x1c0   : > { %p566_p7 = pnand %p565_p4, %p683_p5 }
 0x1c1   : > { %p571_p11 = por %p570_p10, %p569_p9 }
 0x1c2   : > { %p567_p8 = pneg %p566_p7 }
 0x1c4   : > { %p572_p12 = pnand %p571_p11, %p567_p8 }
 0x1c6   : > { %575 = shalt.err (!%p572_p12)
}
 0x1c7   : > { %501 = dma.vmem_to_hbm [thread:$0]  (%p683_p5), %s730_s14, 128, %s728_s17, %s381_s23   ;;  %v500_v26 = vpop.f32.mrf.mxu1 }
 0x1c8 PF: > { %p507_p13 = scmp.ge.s32.totalorder %s610_s21, 2  ;;  %s406_s12 = sand.u32 1, %s598_s18  }
 0x1c9   : > { %s407_s13 = scalar_lea.sflag [#allocation3], %s406_s12 }
 0x1ca   : > { %p504_p0 = pnand %p507_p13, %p687_p6 }
 0x1cc   : > { %p505_p1 = pneg %p504_p0 }
 0x1ce   : > { %593 = dma.done.wait (%p505_p1), %s407_s13, 128  }
 0x1cf   : > { %595 = vsyncadd (%p505_p1), %s407_s13, 4294967168  ;;  %p15_p2 = scmp.ge.s32.totalorder %s670_s24, 4   ;;  %s778_s18 = smov %s602_s19 }
 0x1d0   : > { %s779_s19 = smov %s606_s20  ;;  %s780_s20 = smov %s681_s27 }
 0x1d1   : > { %s781_s21 = smov %s670_s24  ;;  %17 = sbr.rel (!%p15_p2) target bundleno = 3 (0x3), region = 75 }
 0x1d6   :  { %412 = vsyncpa [#allocation3], 1 }
 0x1d7   :  { %414 = vsyncpa [#allocation3 + $0x1], 1 }

</bundles_post_ra>
